<compile_context>
chip_gen: v5e
topology: v5e:2x2
jax: 0.10.0
libtpu: 0.0.40
codegen_flags: <defaults>
</compile_context>

<pallas_src>
import functools

import jax
import jax.numpy as jnp
from jax.experimental import pallas as pl
from jax.experimental.pallas import tpu as pltpu

_EPS = 1e-6  # pairwise_distance default eps


def _contrastive_kernel(o1_ref, o2_ref, lbl_ref, out_ref, acc_ref, *,
                        margin: float, batch: int, tb: int, steps: int):
    """Grid = (num_splits, steps). Each split accumulates its per-sample
    contributions into a (tb,1) VMEM accumulator and writes one scalar partial
    (embedded in an (8,128) lane-aligned block) in its epilogue step."""
    c = pl.program_id(0)
    i = pl.program_id(1)

    @pl.when(i == 0)
    def _():
        acc_ref[...] = jnp.zeros_like(acc_ref)

    # Upcast in-kernel (near-free VPU op; keeps HBM traffic at native width).
    o1 = o1_ref[...].astype(jnp.float32)
    o2 = o2_ref[...].astype(jnp.float32)
    diff = o1 - o2 + _EPS                                   # (tb, D)
    d2 = jnp.sum(diff * diff, axis=-1, keepdims=True)       # (tb, 1)
    d = jnp.sqrt(d2)                                        # euclidean distance

    # Resident label slice for this tile (nominal, unclamped tile index).
    tile = c * steps + i
    row0 = pl.multiple_of(tile * tb, tb)
    lbl = lbl_ref[pl.ds(row0, tb), :]                       # (tb, 1) f32

    hinge = jnp.maximum(margin - d, 0.0)
    per_sample = (1.0 - lbl) * d2 + lbl * (hinge * hinge)   # (tb, 1)

    # Mask rows past the true batch (partial edge tile / clamped duplicate
    # tile). jnp.where discards any garbage (inf/NaN) from the stale tail.
    ridx = row0 + jax.lax.broadcasted_iota(jnp.int32, (tb, 1), 0)
    per_sample = jnp.where(ridx < batch, per_sample, 0.0)

    acc_ref[...] += per_sample

    @pl.when(i == steps - 1)
    def _():
        total = jnp.sum(acc_ref[...])                       # single epilogue reduce
        rr = jax.lax.broadcasted_iota(jnp.int32, out_ref.shape, 0)
        cc = jax.lax.broadcasted_iota(jnp.int32, out_ref.shape, 1)
        out_ref[...] = jnp.where((rr == 0) & (cc == 0), total, 0.0)


def contrastive_loss(output1, output2, label, *, margin: float = 1.0):
    """Pallas ContrastiveLoss. output1/output2: (B, D) (f32 or bf16), label: (B,)."""
    B, D = output1.shape
    itemsize = jnp.dtype(output1.dtype).itemsize

    # --- batch-tile sizing: keep 2 inputs x 2 pipeline buffers <= ~16 MiB ---
    tile_budget = 16 * 1024 * 1024
    bytes_per_row = 2 * 2 * D * itemsize
    tb = tile_budget // bytes_per_row
    tb = max(8, (min(int(tb), 1024) // 8) * 8)   # multiple of 8, <= 1024 rows
    b_ceil8 = ((B + 7) // 8) * 8
    tb = min(tb, b_ceil8)                        # tiny problems -> one grid step

    num_tiles = -(-B // tb)                      # cdiv
    num_splits = 2 if num_tiles >= 2 else 1      # v7x megacore; no-op on v5e/v6e
    steps = -(-num_tiles // num_splits)
    covered = num_splits * steps * tb            # rows addressed by the grid (>= B)
    last_tile = num_tiles - 1

    # Label is tiny: cast + pad once and keep it resident in VMEM (one DMA).
    # TODO(synk): for very large B (>~32k rows) switch the label back to
    # per-tile blocks to bound its resident VMEM footprint.
    lbl = label.reshape(B).astype(jnp.float32)
    lbl = jnp.pad(lbl, (0, covered - B)).reshape(covered, 1)

    data_map = lambda c, i: (jnp.minimum(c * steps + i, last_tile), 0)

    out = pl.pallas_call(
        functools.partial(_contrastive_kernel, margin=float(margin), batch=B,
                          tb=tb, steps=steps),
        out_shape=jax.ShapeDtypeStruct((num_splits * 8, 128), jnp.float32),
        grid_spec=pltpu.PrefetchScalarGridSpec(
            num_scalar_prefetch=0,
            grid=(num_splits, steps),
            in_specs=[
                pl.BlockSpec((tb, D), data_map),          # output1 (native dtype)
                pl.BlockSpec((tb, D), data_map),          # output2 (native dtype)
                pl.BlockSpec((covered, 1), lambda c, i: (0, 0)),  # resident label
            ],
            out_specs=pl.BlockSpec((8, 128), lambda c, i: (c, 0)),
            scratch_shapes=[pltpu.VMEM((tb, 1), jnp.float32)],
        ),
        compiler_params=pltpu.CompilerParams(
            dimension_semantics=("parallel", "arbitrary"),
            vmem_limit_bytes=32 * 1024 * 1024,
        ),
    )(output1, output2, lbl)

    # Sum the per-core partials and take the batch mean (tiny XLA epilogue).
    return jnp.sum(out) / jnp.float32(B)


def _reference(output1, output2, label, margin=1.0):
    diff = output1.astype(jnp.float32) - output2.astype(jnp.float32) + _EPS
    d = jnp.sqrt(jnp.sum(diff * diff, axis=1))
    return jnp.mean((1.0 - label) * d**2
                    + label * jnp.maximum(margin - d, 0.0) ** 2)


if __name__ == "__main__":
    key = jax.random.PRNGKey(0)
    k1, k2, k3 = jax.random.split(key, 3)

    B, D = 16, 32  # small embedding batch consistent with the module's forward
    output1 = jax.random.normal(k1, (B, D), dtype=jnp.float32)
    output2 = jax.random.normal(k2, (B, D), dtype=jnp.float32)
    label = jax.random.bernoulli(k3, 0.5, (B,)).astype(jnp.float32)

    loss = contrastive_loss(output1, output2, label, margin=1.0)
    loss = jax.block_until_ready(loss)

    ref = _reference(output1, output2, label, margin=1.0)
    assert jnp.allclose(loss, ref, rtol=1e-5, atol=1e-5), (loss, ref)

    print("KERNEL_OK")
</pallas_src>

<mosaic_0001>
module attributes {stable_mosaic.version = 11 : i64} {
  func.func @_contrastive_kernel(%arg0: i32, %arg1: i32, %arg2: memref<16x32xf32, #tpu.memory_space<vmem>>, %arg3: memref<16x32xf32, #tpu.memory_space<vmem>>, %arg4: memref<16x1xf32, #tpu.memory_space<vmem>>, %arg5: memref<8x128xf32, #tpu.memory_space<vmem>>, %arg6: memref<16x1xf32, #tpu.memory_space<vmem>>) attributes {dimension_semantics = [#tpu.dimension_semantics<parallel>, #tpu.dimension_semantics<arbitrary>], iteration_bounds = array<i64: 1, 1>, scalar_prefetch = 0 : i64, scratch_operands = 1 : i64, tpu.core_type = #tpu.core_type<tc>, window_params = [{transform_indices = @transform_0, window_bounds = array<i64: 16, 32>}, {transform_indices = @transform_1, window_bounds = array<i64: 16, 32>}, {pipeline_mode = #tpu.pipeline_mode<synchronous>, transform_indices = @transform_2, window_bounds = array<i64: 16, 1>}, {transform_indices = @transform_3, window_bounds = array<i64: 8, 128>}]} {
    %c0_i32 = arith.constant 0 : i32
    %0 = arith.cmpi eq, %arg1, %c0_i32 : i32
    %1 = arith.extui %0 : i1 to i32
    %c0_i32_0 = arith.constant 0 : i32
    %2 = arith.cmpi ne, %1, %c0_i32_0 : i32
    scf.if %2 {
      %cst_17 = arith.constant 0.000000e+00 : f32
      %41 = vector.broadcast %cst_17 : f32 to vector<16x1xf32>
      %c0_18 = arith.constant 0 : index
      %c0_19 = arith.constant 0 : index
      %42 = vector.load %arg6[%c0_18, %c0_19] : memref<16x1xf32, #tpu.memory_space<vmem>>, vector<16x1xf32>
      tpu.vector_store %arg6[%c0_18, %c0_19], %41 {strides = array<i32>} : memref<16x1xf32, #tpu.memory_space<vmem>>, vector<16x1xf32>,
    } else {
    }
    %c0 = arith.constant 0 : index
    %c0_1 = arith.constant 0 : index
    %3 = vector.load %arg2[%c0, %c0_1] : memref<16x32xf32, #tpu.memory_space<vmem>>, vector<16x32xf32>
    %c0_2 = arith.constant 0 : index
    %c0_3 = arith.constant 0 : index
    %4 = vector.load %arg3[%c0_2, %c0_3] : memref<16x32xf32, #tpu.memory_space<vmem>>, vector<16x32xf32>
    %5 = arith.subf %3, %4 : vector<16x32xf32>
    %cst = arith.constant 9.99999997E-7 : f32
    %6 = vector.broadcast %cst : f32 to vector<16x32xf32>
    %7 = arith.addf %5, %6 : vector<16x32xf32>
    %8 = arith.mulf %7, %7 : vector<16x32xf32>
    %cst_4 = arith.constant dense<0.000000e+00> : vector<16xf32>
    %9 = vector.multi_reduction <add>, %8, %cst_4 [1] : vector<16x32xf32> to vector<16xf32>
    %10 = vector.shape_cast %9 : vector<16xf32> to vector<16x1xf32>
    %11 = math.sqrt %10 : vector<16x1xf32>
    %c1_i32 = arith.constant 1 : i32
    %12 = arith.muli %arg0, %c1_i32 : i32
    %13 = arith.addi %12, %arg1 : i32
    %c16_i32 = arith.constant 16 : i32
    %14 = arith.muli %13, %c16_i32 : i32
    %15 = tpu.assume_multiple %14, 16 : i32
    %16 = arith.index_cast %15 : i32 to index
    %c0_5 = arith.constant 0 : index
    %17 = vector.load %arg4[%16, %c0_5] : memref<16x1xf32, #tpu.memory_space<vmem>>, vector<16x1xf32>
    %cst_6 = arith.constant 1.000000e+00 : f32
    %18 = vector.broadcast %cst_6 : f32 to vector<16x1xf32>
    %19 = arith.subf %18, %11 : vector<16x1xf32>
    %cst_7 = arith.constant 0.000000e+00 : f32
    %20 = vector.broadcast %cst_7 : f32 to vector<16x1xf32>
    %21 = arith.maximumf %19, %20 : vector<16x1xf32>
    %cst_8 = arith.constant 1.000000e+00 : f32
    %22 = vector.broadcast %cst_8 : f32 to vector<16x1xf32>
    %23 = arith.subf %22, %17 : vector<16x1xf32>
    %24 = arith.mulf %23, %10 : vector<16x1xf32>
    %25 = arith.mulf %21, %21 : vector<16x1xf32>
    %26 = arith.mulf %17, %25 : vector<16x1xf32>
    %27 = arith.addf %24, %26 : vector<16x1xf32>
    %28 = tpu.iota {dimensions = array<i32: 0>} : vector<16x1xi32>
    %29 = vector.broadcast %15 : i32 to vector<16x1xi32>
    %30 = arith.addi %29, %28 : vector<16x1xi32>
    %c16_i32_9 = arith.constant 16 : i32
    %31 = vector.broadcast %c16_i32_9 : i32 to vector<16x1xi32>
    %32 = arith.cmpi slt, %30, %31 : vector<16x1xi32>
    %cst_10 = arith.constant 0.000000e+00 : f32
    %33 = vector.broadcast %cst_10 : f32 to vector<16x1xf32>
    %34 = arith.select %32, %27, %33 : vector<16x1xi1>, vector<16x1xf32>
    %c0_11 = arith.constant 0 : index
    %c0_12 = arith.constant 0 : index
    %35 = vector.load %arg6[%c0_11, %c0_12] : memref<16x1xf32, #tpu.memory_space<vmem>>, vector<16x1xf32>
    %36 = arith.addf %35, %34 : vector<16x1xf32>
    %c0_13 = arith.constant 0 : index
    %c0_14 = arith.constant 0 : index
    %37 = vector.load %arg6[%c0_13, %c0_14] : memref<16x1xf32, #tpu.memory_space<vmem>>, vector<16x1xf32>
    tpu.vector_store %arg6[%c0_13, %c0_14], %36 {strides = array<i32>} : memref<16x1xf32, #tpu.memory_space<vmem>>, vector<16x1xf32>,
    %c0_i32_15 = arith.constant 0 : i32
    %38 = arith.cmpi eq, %arg1, %c0_i32_15 : i32
    %39 = arith.extui %38 : i1 to i32
    %c0_i32_16 = arith.constant 0 : i32
    %40 = arith.cmpi ne, %39, %c0_i32_16 : i32
    scf.if %40 {
      %c0_17 = arith.constant 0 : index
      %c0_18 = arith.constant 0 : index
      %41 = vector.load %arg6[%c0_17, %c0_18] : memref<16x1xf32, #tpu.memory_space<vmem>>, vector<16x1xf32>
      %42 = vector.shape_cast %41 : vector<16x1xf32> to vector<1x16x1xf32>
      %cst_19 = arith.constant dense<0.000000e+00> : vector<1xf32>
      %43 = vector.multi_reduction <add>, %42, %cst_19 [1, 2] : vector<1x16x1xf32> to vector<1xf32>
      %44 = vector.shape_cast %43 : vector<1xf32> to vector<1x1x1xf32>
      %45 = vector.extract %44[0, 0, 0] : f32 from vector<1x1x1xf32>
      %46 = tpu.iota {dimensions = array<i32: 0>} : vector<8x128xi32>
      %47 = tpu.iota {dimensions = array<i32: 1>} : vector<8x128xi32>
      %c0_i32_20 = arith.constant 0 : i32
      %48 = vector.broadcast %c0_i32_20 : i32 to vector<8x128xi32>
      %49 = arith.cmpi eq, %46, %48 : vector<8x128xi32>
      %c0_i32_21 = arith.constant 0 : i32
      %50 = vector.broadcast %c0_i32_21 : i32 to vector<8x128xi32>
      %51 = arith.cmpi eq, %47, %50 : vector<8x128xi32>
      %52 = arith.andi %49, %51 : vector<8x128xi1>
      %cst_22 = arith.constant 0.000000e+00 : f32
      %53 = vector.broadcast %45 : f32 to vector<8x128xf32>
      %54 = vector.broadcast %cst_22 : f32 to vector<8x128xf32>
      %55 = arith.select %52, %53, %54 : vector<8x128xi1>, vector<8x128xf32>
      %c0_23 = arith.constant 0 : index
      %c0_24 = arith.constant 0 : index
      %56 = vector.load %arg5[%c0_23, %c0_24] : memref<8x128xf32, #tpu.memory_space<vmem>>, vector<8x128xf32>
      tpu.vector_store %arg5[%c0_23, %c0_24], %55 {strides = array<i32>} : memref<8x128xf32, #tpu.memory_space<vmem>>, vector<8x128xf32>,
    } else {
    }
    return
  }
  func.func @transform_0(%arg0: i32, %arg1: i32) -> (i32, i32) {
    %c1_i32 = arith.constant 1 : i32
    %0 = arith.muli %arg0, %c1_i32 : i32
    %1 = arith.addi %0, %arg1 : i32
    %c0_i32 = arith.constant 0 : i32
    %2 = arith.minsi %1, %c0_i32 : i32
    %c0_i32_0 = arith.constant 0 : i32
    %c0_i32_1 = arith.constant 0 : i32
    return %2, %c0_i32_0 : i32, i32
  }
  func.func @transform_1(%arg0: i32, %arg1: i32) -> (i32, i32) {
    %c1_i32 = arith.constant 1 : i32
    %0 = arith.muli %arg0, %c1_i32 : i32
    %1 = arith.addi %0, %arg1 : i32
    %c0_i32 = arith.constant 0 : i32
    %2 = arith.minsi %1, %c0_i32 : i32
    %c0_i32_0 = arith.constant 0 : i32
    %c0_i32_1 = arith.constant 0 : i32
    return %2, %c0_i32_0 : i32, i32
  }
  func.func @transform_2(%arg0: i32, %arg1: i32) -> (i32, i32) {
    %c0_i32 = arith.constant 0 : i32
    %c0_i32_0 = arith.constant 0 : i32
    %c0_i32_1 = arith.constant 0 : i32
    return %c0_i32, %c0_i32_0 : i32, i32
  }
  func.func @transform_3(%arg0: i32, %arg1: i32) -> (i32, i32) {
    %c0_i32 = arith.constant 0 : i32
    %c0_i32_0 = arith.constant 0 : i32
    return %arg0, %c0_i32 : i32, i32
  }
}

</mosaic_0001>

<bundles_post_ra>
// kernel: tpu_custom_call.1
= control target key start
LH: loop header
LB: loop body
LE: loop exit
PB: predicated region body
PF: predicated region fallthrough
CT: control target
= control target key end

     0   :  { %8 = vsyncpa [#allocation4], 0  ;;  %s319_s0 = inlined_call_operand.vmem [shape: f32[16,32], index: 0, kind: input, shape index: {}]   ;;  %s320_s1 = inlined_call_operand.hbm [shape: f32[16,32], index: 1, kind: input, shape index: {}]   ;;  %s321_s2 = inlined_call_operand.vmem [shape: f32[16,1], index: 2, kind: input, shape index: {}]   ;;  %s322_s3 = inlined_call_operand.hbm [shape: f32[8,128], index: 3, kind: output, shape index: {}]  }
   0x1   :  { %9 = vsyncpa [#allocation5], 0  ;;  %s34_s14 = sshll.u32 %s320_s1, 4  ;;  %s270_s15 = smov [#allocation3]   ;;  %s35_s14 = int_to_ptr.hbm [resolvable:$true] %s34_s14 }
   0x2   :  { %s36_s16 = sshll.u32 %s270_s15, 4  ;;  %s271_s17 = smov 128   ;;  %s37_s16 = int_to_ptr.vmem [resolvable:$true] %s36_s16 }
   0x3   :  { %s272_s18 = smov 8  }
   0x4   :  { %42 = dma.hbm_to_vmem [thread:$0]  %s35_s14, 256, %s37_s16, [#allocation4], %s271_s17, %s271_s17, %s272_s18  }
   0x5   :  { %266 = dma.done.wait [#allocation4], 256  }
   0x6   :  { %267 = vsyncadd [#allocation4], 4294967040  ;;  %v80_v0 = vld [vmem:[%s319_s0] sm:$0xff]  ;;  %v82_v1 = vld [vmem:[#allocation3] sm:$0xff]  ;;  %vm90_vm0 = vcmask 261120   ;;  %vm77_vm1 = vcmask 7168  }
   0x7   :  { %v81_v2 = vld [vmem:[%s319_s0 + $0x8] sm:$0xff]  ;;  %v84_v3 = vsub.f32 %v80_v0, %v82_v1  ;;  %v83_v4 = vld [vmem:[#allocation3 + $0x8] sm:$0xff]  ;;  %v273_v12 = vmov 0.0   ;;  %v124_v28 = vld [vmem:[%s321_s2] sm:$0xff]  ;;  %s189_s28 = sshll.u32 %s322_s3, 4  ;;  %s190_s28 = int_to_ptr.hbm [resolvable:$true] %s189_s28 }
   0x8   :  { %v85_v5 = vsub.f32 %v81_v2, %v83_v4  ;;  %78 = vst.msk [vmem:[#allocation2] sm:$0xff] %vm77_vm1, %v273_v12  ;;  %v130_v32 = vsub.f32 1.0, %v124_v28  ;;  %v125_v41 = vld [vmem:[%s321_s2 + $0x8] sm:$0xff]  ;;  %s274_s2 = smov [#allocation6]  }
   0x9   :  { %v86_v6 = vadd.f32 1e-06, %v84_v3  ;;  %79 = vst.msk [vmem:[#allocation2 + $0x8] sm:$0xff] %vm77_vm1, %v273_v12  ;;  %v131_v46 = vsub.f32 1.0, %v125_v41  ;;  %v140_v3 = vlaneseq  ;;  %s187_s25 = sshll.u32 %s274_s2, 4  ;;  %s188_s25 = int_to_ptr.vmem [resolvable:$true] %s187_s25 }
   0xa   :  { %v87_v8 = vadd.f32 1e-06, %v85_v5 }
   0xb   :  { %v88_v7 = vmul.f32 %v86_v6, %v86_v6  ;;  %v141_v4 = vshrl.u32 %v140_v3, 7  ;;  %v175_v5 = vand.u32 127, %v140_v3 }
   0xc   :  { %v89_v10 = vmul.f32 %v87_v8, %v87_v8 }
   0xd   :  { %v91_v9 = vsel %vm90_vm0, %v88_v7, 0.0  ;;  %vm176_vm6 = vcmp.eq.s32.totalorder %v141_v4, 0  ;;  %vm177_vm7 = vcmp.eq.s32.totalorder %v175_v5, 0 }
   0xe   :  { %92 = vadd.xlane.f32.xlu0 %v91_v9  ;;  %v94_v11 = vsel %vm90_vm0, %v89_v10, 0.0  ;;  %vm178_vm8 = vmand %vm176_vm6, %vm177_vm7 }
   0xf   :  { %v150_v43 = vld [vmem:[#allocation2] sm:$0xff] }
  0x10   :  { %v151_v52 = vld [vmem:[#allocation2 + $0x8] sm:$0xff] }
  0x16   :  { %95 = vadd.xlane.f32.xlu0 %v94_v11 }
  0x81   :  { %v93_v13 = vpop.xlane.xlu0 %92 }
  0x82   :  { %214 = vrsqrt.f32 %v93_v13  ;;  %vm104_vm2 = vcmp.eq.f32.partialorder %v93_v13, inf  ;;  %v107_v25 = vand.u32 2147483648, %v93_v13  ;;  %vm106_vm3 = vcmp.eq.f32.partialorder %v93_v13, 0.0 }
  0x83   :  { %v132_v38 = vmul.f32 %v130_v32, %v93_v13 }
  0x88   :  { %v215_v14 = vpop.eup %214 }
  0x89   :  { %v98_v15 = vmul.f32 %v215_v14, %v93_v13  ;;  %v96_v16 = vpop.xlane.xlu0 %95 }
  0x8a   :  { %216 = vrsqrt.f32 %v96_v16  ;;  %vm116_vm4 = vcmp.eq.f32.partialorder %v96_v16, inf  ;;  %v119_v37 = vand.u32 2147483648, %v96_v16  ;;  %vm118_vm5 = vcmp.eq.f32.partialorder %v96_v16, 0.0 }
  0x8b   :  { %v99_v17 = vmul.f32 %v215_v14, %v98_v15  ;;  %v133_v50 = vmul.f32 %v131_v46, %v96_v16 }
  0x8d   :  { %v100_v18 = vmul.f32 0.5, %v99_v17 }
  0x8f   :  { %v101_v19 = vsub.f32 1.5, %v100_v18 }
  0x90   :  { %v217_v20 = vpop.eup %216 }
  0x91   :  { %v102_v21 = vmul.f32 %v215_v14, %v101_v19  ;;  %v110_v22 = vmul.f32 %v217_v20, %v96_v16 }
  0x93   :  { %v103_v23 = vmul.f32 %v102_v21, %v93_v13  ;;  %v111_v24 = vmul.f32 %v217_v20, %v110_v22 }
  0x95   :  { %v105_v26 = vsel %vm104_vm2, %v93_v13, %v103_v23  ;;  %v112_v27 = vmul.f32 0.5, %v111_v24 }
  0x96   :  { %v108_v29 = vsel %vm106_vm3, %v107_v25, %v105_v26 }
  0x97   :  { %v126_v30 = vsub.f32 1.0, %v108_v29  ;;  %v113_v31 = vsub.f32 1.5, %v112_v27 }
  0x99   :  { %v128_v33 = vmax.f32 %v126_v30, 0.0  ;;  %v114_v34 = vmul.f32 %v217_v20, %v113_v31 }
  0x9b   :  { %v134_v35 = vmul.f32 %v128_v33, %v128_v33  ;;  %v115_v36 = vmul.f32 %v114_v34, %v96_v16 }
  0x9d   :  { %v136_v39 = vmul.f32 %v134_v35, %v124_v28  ;;  %v117_v40 = vsel %vm116_vm4, %v96_v16, %v115_v36 }
  0x9e   :  { %v120_v42 = vsel %vm118_vm5, %v119_v37, %v117_v40 }
  0x9f   :  { %v138_v44 = vadd.f32 %v136_v39, %v132_v38  ;;  %v127_v45 = vsub.f32 1.0, %v120_v42 }
  0xa1   :  { %v129_v47 = vmax.f32 %v127_v45, 0.0  ;;  %v152_v48 = vadd.f32 %v150_v43, %v138_v44 }
  0xa3   :  { %v135_v49 = vmul.f32 %v129_v47, %v129_v47  ;;  %155 = vst.msk [vmem:[#allocation2] sm:$0xff] %vm77_vm1, %v152_v48 }
  0xa5   :  { %v137_v51 = vmul.f32 %v135_v49, %v125_v41 }
  0xa7   :  { %v139_v53 = vadd.f32 %v137_v51, %v133_v50 }
  0xa9   :  { %v153_v54 = vadd.f32 %v151_v52, %v139_v53 }
  0xaa   :  { %v160_v55 = vld [vmem:[#allocation2] sm:$0xff] }
  0xab   :  { %156 = vst.msk [vmem:[#allocation2 + $0x8] sm:$0xff] %vm77_vm1, %v153_v54  ;;  %v162_v57 = vsel %vm77_vm1, %v160_v55, 0.0 }
  0xb2   :  { %v161_v56 = vld [vmem:[#allocation2 + $0x8] sm:$0xff] }
  0xb3   :  { %v163_v58 = vsel %vm77_vm1, %v161_v56, 0.0 }
  0xb4   :  { %v164_v59 = vadd.f32 %v163_v58, %v162_v57 }
  0xb6   :  { %165 = vadd.xlane.f32.xlu1 %v164_v59 }
 0x129   :  { %v166_v60 = vpop.xlane.xlu1 %165 }
 0x12a   :  { %v167_v61 = vrot.slane %v166_v60, 4 }
 0x12c   :  { %v168_v62 = vadd.f32 %v167_v61, %v166_v60 }
 0x12e   :  { %v169_v63 = vrot.slane %v168_v62, 2 }
 0x130   :  { %v170_v0 = vadd.f32 %v169_v63, %v168_v62 }
 0x132   :  { %v171_v1 = vrot.slane %v170_v0, 1 }
 0x134   :  { %v172_v2 = vadd.f32 %v171_v1, %v170_v0 }
 0x136   :  { %207 = vpush %v172_v2 }
 0x167   :  { %s208_s29 = spop %207 }
 0x168   :  { %v179_v6 = vstv %s208_s29 }
 0x169   :  { %v180_v7 = vsel %vm178_vm8, %v179_v6, 0.0 }
 0x16a   :  { %181 = vst [vmem:[#allocation6] sm:$0xff] %v180_v7 }
 0x16b   :  { %192 = dma.vmem_to_hbm [thread:$0]  %s188_s25, 128, %s190_s28, [#allocation5]  }
 0x16c   :  { %268 = dma.done.wait [#allocation5], 128  }
 0x16d   :  { %269 = vsyncadd [#allocation5], 4294967168 }
 0x16e   :  { %197 = vsyncpa [#allocation4], 1 }
 0x16f   :  { %198 = vsyncpa [#allocation5], 1 }

</bundles_post_ra>
